<compile_context>
chip_gen: v6e
topology: v6e:2x2x1
jax: 0.10.0
libtpu: 0.0.40
codegen_flags: <defaults>
</compile_context>

<pallas_src>
import functools

import jax
import jax.numpy as jnp
from jax.experimental import pallas as pl
from jax.experimental.pallas import tpu as pltpu


# ---------------------------------------------------------------------------
# Generic tiled  O = act(A @ B + bias)  kernel.
#   grid = (M/tm, N/tn, K/tk); accumulator resident across the k axis.
# ---------------------------------------------------------------------------
def _matmul_bias_kernel(a_ref, b_ref, bias_ref, o_ref, acc_ref, *, apply_relu):
    k = pl.program_id(2)

    @pl.when(k == 0)
    def _():
        acc_ref[...] = jnp.zeros_like(acc_ref)

    acc_ref[...] += jnp.dot(
        a_ref[...], b_ref[...], preferred_element_type=jnp.float32
    )

    @pl.when(k == pl.num_programs(2) - 1)
    def _():
        out = acc_ref[...] + bias_ref[...]          # (1, tn) broadcasts over rows
        if apply_relu:
            out = jnp.maximum(out, 0.0)
        o_ref[...] = out.astype(o_ref.dtype)


def tiled_matmul_bias(a, b, bias, *, apply_relu, out_dtype,
                      tm=256, tn=256, tk=256):
    """a:[M,K], b:[K,N], bias:[1,N] (f32). M%tm == N%tn == K%tk == 0."""
    m, k = a.shape
    k2, n = b.shape
    assert k == k2 and bias.shape == (1, n)
    assert m % tm == 0 and n % tn == 0 and k % tk == 0

    # VMEM budget for this tile choice (double-buffered in/out + accumulator).
    need = (2 * (tm * tk * a.dtype.itemsize + tk * tn * b.dtype.itemsize)
            + 2 * tn * 4
            + 2 * tm * tn * jnp.dtype(out_dtype).itemsize
            + tm * tn * 4)
    vmem_limit = min(max(2 * need, 8 * 1024 * 1024), 32 * 1024 * 1024)

    kernel = functools.partial(_matmul_bias_kernel, apply_relu=apply_relu)
    return pl.pallas_call(
        kernel,
        out_shape=jax.ShapeDtypeStruct((m, n), out_dtype),
        grid_spec=pltpu.PrefetchScalarGridSpec(
            num_scalar_prefetch=0,
            grid=(m // tm, n // tn, k // tk),
            in_specs=[
                pl.BlockSpec((tm, tk), lambda i, j, kk: (i, kk)),
                pl.BlockSpec((tk, tn), lambda i, j, kk: (kk, j)),
                pl.BlockSpec((1, tn), lambda i, j, kk: (0, j)),
            ],
            out_specs=pl.BlockSpec((tm, tn), lambda i, j, kk: (i, j)),
            scratch_shapes=[pltpu.VMEM((tm, tn), jnp.float32)],
        ),
        compiler_params=pltpu.CompilerParams(
            dimension_semantics=("parallel", "parallel", "arbitrary"),
            vmem_limit_bytes=vmem_limit,
        ),
    )(a, b, bias)


# ---------------------------------------------------------------------------
# Graph densification + GCN normalization (plain JAX glue).
# Matches torch_geometric gcn_norm(add_self_loops=True): self-loops with
# weight 1 are added only to nodes that do not already have one.
# ---------------------------------------------------------------------------
def gcn_normalized_adjacency(edge_index, edge_weight, num_nodes):
    src, dst = edge_index[0], edge_index[1]
    has_loop = jnp.zeros((num_nodes,), jnp.int32).at[src].max(
        (src == dst).astype(jnp.int32))
    loops = jnp.arange(num_nodes, dtype=edge_index.dtype)
    loop_w = (1 - has_loop).astype(edge_weight.dtype)   # weight-0 loop == no-op
    src = jnp.concatenate([src, loops])
    dst = jnp.concatenate([dst, loops])
    w = jnp.concatenate([edge_weight, loop_w])
    deg = jnp.zeros((num_nodes,), jnp.float32).at[dst].add(w)
    dinv = jnp.where(deg > 0, 1.0 / jnp.sqrt(deg), 0.0)
    norm = dinv[src] * w * dinv[dst]
    # A_hat[dst, src] = norm  =>  aggregation is  A_hat @ (X W)
    return jnp.zeros((num_nodes, num_nodes), jnp.float32).at[dst, src].add(norm)


def _round_up(x, m):
    return ((x + m - 1) // m) * m


def _pad2d(x, rows, cols):
    return jnp.pad(x, ((0, rows - x.shape[0]), (0, cols - x.shape[1])))


# ---------------------------------------------------------------------------
# Two-layer GCN forward, fully in Pallas (4 tiled matmul calls).
# ---------------------------------------------------------------------------
def gcn2_pallas(a_hat, x, w1, b1, w2, b2, *, tile=256):
    n, in_dim = x.shape
    hidden = w1.shape[1]
    out_dim = w2.shape[1]

    n_p = _round_up(n, tile)
    f_p = _round_up(in_dim, tile)
    h_p = _round_up(hidden, tile)
    o_p = _round_up(out_dim, tile)

    # bf16 operands for the MXU (halves A_hat HBM/VMEM bytes); f32 accum/bias.
    a_p = _pad2d(a_hat, n_p, n_p).astype(jnp.bfloat16)
    x_p = _pad2d(x, n_p, f_p).astype(jnp.bfloat16)
    w1_p = _pad2d(w1, f_p, h_p).astype(jnp.bfloat16)
    w2_p = _pad2d(w2, h_p, o_p).astype(jnp.bfloat16)
    b1_p = _pad2d(b1.astype(jnp.float32), 1, h_p)
    b2_p = _pad2d(b2.astype(jnp.float32), 1, o_p)
    zero_h = jnp.zeros((1, h_p), jnp.float32)
    zero_o = jnp.zeros((1, o_p), jnp.float32)

    mm = functools.partial(tiled_matmul_bias, tm=tile, tn=tile, tk=tile)

    # layer 1: projection, then aggregation (+bias, +ReLU)
    xw1 = mm(x_p, w1_p, zero_h, apply_relu=False, out_dtype=jnp.bfloat16)
    h = mm(a_p, xw1, b1_p, apply_relu=True, out_dtype=jnp.bfloat16)
    # (dropout p=0.5 between layers is identity at inference)
    # layer 2: projection, then aggregation (+bias)
    hw2 = mm(h, w2_p, zero_o, apply_relu=False, out_dtype=jnp.bfloat16)
    out = mm(a_p, hw2, b2_p, apply_relu=False, out_dtype=jnp.float32)

    return out[:n, :out_dim]


def gcn2_forward(x, edge_index, edge_weight, params):
    # TODO(synk): training-mode F.dropout(p=0.5) would use pltpu.prng_random_bits
    # inside the kernel; eval mode (as benchmarked) is identity.
    # TODO(synk): for E << N^2 a sparse (scalar-prefetch CSR gather) formulation
    # avoids the dense O(N^2) A_hat; dense is kept here for exact GCNConv math.
    a_hat = gcn_normalized_adjacency(edge_index, edge_weight, x.shape[0])
    return gcn2_pallas(a_hat, x, params["w1"], params["b1"],
                       params["w2"], params["b2"])


# Pure-JAX reference with the same bf16 operand casts (tight comparison).
def gcn2_ref(x, edge_index, edge_weight, params):
    a = gcn_normalized_adjacency(edge_index, edge_weight, x.shape[0]).astype(jnp.bfloat16)
    xb = x.astype(jnp.bfloat16)
    w1 = params["w1"].astype(jnp.bfloat16)
    w2 = params["w2"].astype(jnp.bfloat16)
    xw1 = jnp.dot(xb, w1, preferred_element_type=jnp.float32).astype(jnp.bfloat16)
    h = jnp.maximum(
        jnp.dot(a, xw1, preferred_element_type=jnp.float32) + params["b1"], 0.0
    ).astype(jnp.bfloat16)
    hw2 = jnp.dot(h, w2, preferred_element_type=jnp.float32).astype(jnp.bfloat16)
    return jnp.dot(a, hw2, preferred_element_type=jnp.float32) + params["b2"]


def glorot(key, shape):
    fan_in, fan_out = shape
    limit = jnp.sqrt(6.0 / (fan_in + fan_out))
    return jax.random.uniform(key, shape, jnp.float32, -limit, limit)


if __name__ == "__main__":
    # small shapes implied by the module: N nodes, in_dim -> hidden -> out_dim
    N, E = 8, 16
    in_dim, hidden_dim, out_dim = 16, 32, 8

    key = jax.random.PRNGKey(0)
    k_x, k_src, k_dst, k_w, k_w1, k_w2 = jax.random.split(key, 6)

    x = jax.random.normal(k_x, (N, in_dim), jnp.float32)
    edge_index = jnp.stack(
        [jax.random.randint(k_src, (E,), 0, N),
         jax.random.randint(k_dst, (E,), 0, N)]
    ).astype(jnp.int32)                                   # [2, E]
    edge_weight = jax.random.uniform(k_w, (E,), jnp.float32, 0.1, 1.0)

    params = {
        "w1": glorot(k_w1, (in_dim, hidden_dim)),
        "b1": jnp.zeros((1, hidden_dim), jnp.float32),     # GCNConv bias init = zeros
        "w2": glorot(k_w2, (hidden_dim, out_dim)),
        "b2": jnp.zeros((1, out_dim), jnp.float32),
    }

    out = gcn2_forward(x, edge_index, edge_weight, params)
    out = jax.block_until_ready(out)

    ref = gcn2_ref(x, edge_index, edge_weight, params)
    assert out.shape == (N, out_dim)
    assert jnp.allclose(out, ref, atol=2e-2, rtol=2e-2), (
        float(jnp.max(jnp.abs(out - ref))))

    print("KERNEL_OK")
</pallas_src>

<mosaic_0001>
module attributes {stable_mosaic.version = 11 : i64} {
  func.func @_matmul_bias_kernel(%arg0: i32, %arg1: i32, %arg2: i32, %arg3: memref<256x256xbf16, #tpu.memory_space<vmem>>, %arg4: memref<256x256xbf16, #tpu.memory_space<vmem>>, %arg5: memref<1x256xf32, #tpu.memory_space<vmem>>, %arg6: memref<256x256xbf16, #tpu.memory_space<vmem>>, %arg7: memref<256x256xf32, #tpu.memory_space<vmem>>) attributes {dimension_semantics = [#tpu.dimension_semantics<parallel>, #tpu.dimension_semantics<parallel>, #tpu.dimension_semantics<arbitrary>], iteration_bounds = array<i64: 1, 1, 1>, scalar_prefetch = 0 : i64, scratch_operands = 1 : i64, tpu.core_type = #tpu.core_type<tc>, window_params = [{transform_indices = @transform_0, window_bounds = array<i64: 256, 256>}, {transform_indices = @transform_1, window_bounds = array<i64: 256, 256>}, {transform_indices = @transform_2, window_bounds = array<i64: 1, 256>}, {transform_indices = @transform_3, window_bounds = array<i64: 256, 256>}]} {
    %c0_i32 = arith.constant 0 : i32
    %0 = arith.cmpi eq, %arg2, %c0_i32 : i32
    %1 = arith.extui %0 : i1 to i32
    %c0_i32_0 = arith.constant 0 : i32
    %2 = arith.cmpi ne, %1, %c0_i32_0 : i32
    scf.if %2 {
      %cst_10 = arith.constant 0.000000e+00 : f32
      %12 = vector.broadcast %cst_10 : f32 to vector<256x256xf32>
      %c0_11 = arith.constant 0 : index
      %c0_12 = arith.constant 0 : index
      %13 = vector.load %arg7[%c0_11, %c0_12] : memref<256x256xf32, #tpu.memory_space<vmem>>, vector<256x256xf32>
      tpu.vector_store %arg7[%c0_11, %c0_12], %12 {strides = array<i32>} : memref<256x256xf32, #tpu.memory_space<vmem>>, vector<256x256xf32>,
    } else {
    }
    %c0 = arith.constant 0 : index
    %c0_1 = arith.constant 0 : index
    %3 = vector.load %arg7[%c0, %c0_1] : memref<256x256xf32, #tpu.memory_space<vmem>>, vector<256x256xf32>
    %c0_2 = arith.constant 0 : index
    %c0_3 = arith.constant 0 : index
    %4 = vector.load %arg3[%c0_2, %c0_3] : memref<256x256xbf16, #tpu.memory_space<vmem>>, vector<256x256xbf16>
    %c0_4 = arith.constant 0 : index
    %c0_5 = arith.constant 0 : index
    %5 = vector.load %arg4[%c0_4, %c0_5] : memref<256x256xbf16, #tpu.memory_space<vmem>>, vector<256x256xbf16>
    %cst = arith.constant dense<0.000000e+00> : vector<256x256xf32>
    %6 = tpu.matmul %4, %5, %cst {dimension_numbers = #tpu.dot_dimension_numbers<[1], [0], [0], [1], [0, 0, 1, 1], [], []>} : vector<256x256xbf16>, vector<256x256xbf16>, vector<256x256xf32> -> vector<256x256xf32>
    %7 = arith.addf %3, %6 : vector<256x256xf32>
    %c0_6 = arith.constant 0 : index
    %c0_7 = arith.constant 0 : index
    %8 = vector.load %arg7[%c0_6, %c0_7] : memref<256x256xf32, #tpu.memory_space<vmem>>, vector<256x256xf32>
    tpu.vector_store %arg7[%c0_6, %c0_7], %7 {strides = array<i32>} : memref<256x256xf32, #tpu.memory_space<vmem>>, vector<256x256xf32>,
    %c0_i32_8 = arith.constant 0 : i32
    %9 = arith.cmpi eq, %arg2, %c0_i32_8 : i32
    %10 = arith.extui %9 : i1 to i32
    %c0_i32_9 = arith.constant 0 : i32
    %11 = arith.cmpi ne, %10, %c0_i32_9 : i32
    scf.if %11 {
      %c0_10 = arith.constant 0 : index
      %c0_11 = arith.constant 0 : index
      %12 = vector.load %arg7[%c0_10, %c0_11] : memref<256x256xf32, #tpu.memory_space<vmem>>, vector<256x256xf32>
      %c0_12 = arith.constant 0 : index
      %c0_13 = arith.constant 0 : index
      %13 = vector.load %arg5[%c0_12, %c0_13] : memref<1x256xf32, #tpu.memory_space<vmem>>, vector<1x256xf32>
      %14 = vector.broadcast %13 : vector<1x256xf32> to vector<256x256xf32>
      %15 = arith.addf %12, %14 : vector<256x256xf32>
      %16 = arith.truncf %15 : vector<256x256xf32> to vector<256x256xbf16>
      %c0_14 = arith.constant 0 : index
      %c0_15 = arith.constant 0 : index
      %17 = vector.load %arg6[%c0_14, %c0_15] : memref<256x256xbf16, #tpu.memory_space<vmem>>, vector<256x256xbf16>
      tpu.vector_store %arg6[%c0_14, %c0_15], %16 {strides = array<i32>} : memref<256x256xbf16, #tpu.memory_space<vmem>>, vector<256x256xbf16>,
    } else {
    }
    return
  }
  func.func @transform_0(%arg0: i32, %arg1: i32, %arg2: i32) -> (i32, i32) {
    %c0_i32 = arith.constant 0 : i32
    return %arg0, %arg2 : i32, i32
  }
  func.func @transform_1(%arg0: i32, %arg1: i32, %arg2: i32) -> (i32, i32) {
    %c0_i32 = arith.constant 0 : i32
    return %arg2, %arg1 : i32, i32
  }
  func.func @transform_2(%arg0: i32, %arg1: i32, %arg2: i32) -> (i32, i32) {
    %c0_i32 = arith.constant 0 : i32
    %c0_i32_0 = arith.constant 0 : i32
    return %c0_i32, %arg1 : i32, i32
  }
  func.func @transform_3(%arg0: i32, %arg1: i32, %arg2: i32) -> (i32, i32) {
    %c0_i32 = arith.constant 0 : i32
    return %arg0, %arg1 : i32, i32
  }
}

</mosaic_0001>

<bundles_post_ra>
// kernel: tpu_custom_call.1
= control target key start
LH: loop header
LB: loop body
LE: loop exit
PB: predicated region body
PF: predicated region fallthrough
CT: control target
= control target key end

     0   :  { %8 = vsyncpa [#allocation4], 0  ;;  %s1706_s0 = inlined_call_operand.hbm [shape: bf16[256,256], index: 0, kind: input, shape index: {}]   ;;  %s1707_s1 = inlined_call_operand.hbm [shape: bf16[256,256], index: 1, kind: input, shape index: {}]   ;;  %s1708_s2 = inlined_call_operand.vmem [shape: f32[1,256], index: 2, kind: input, shape index: {}]   ;;  %s1709_s3 = inlined_call_operand.hbm [shape: bf16[256,256], index: 3, kind: output, shape index: {}]  }
   0x1   :  { %9 = vsyncpa [#allocation7], 0 }
   0x2   :  { %10 = vsyncpa [#allocation5], 0  ;;  %s1592_s12 = smov [#allocation3]  }
   0x3   :  { %s16_s13 = sshll.u32 %s1592_s12, 4  ;;  %s17_s13 = int_to_ptr.vmem [resolvable:$true] %s16_s13 }
   0x4   :  { %s1534_s14 = scalar_lea.vmem %s17_s13, 4096  ;;  %p1539_p1 = scmp.lt.s32.totalorder %s17_s13, %s17_s13 }
   0x5   :  { %p1535_p0 = scmp.ne.s32.totalorder %s17_s13, %s1534_s14  ;;  %p1540_p2 = scmp.lt.s32.totalorder %s1534_s14, %s1534_s14 }
   0x7   :  { %p1541_p3 = por %p1540_p2, %p1539_p1 }
   0x9   :  { %p1542_p4 = pnand %p1541_p3, %p1535_p0 }
   0xb   :  { %1545 = shalt.err (!%p1542_p4)
}
   0xc   :  { %s1593_s15 = smov 128   ;;  %s1594_s16 = smov 8  }
   0xd   :  { %22 = dma.hbm_to_vmem [thread:$0]  %s1706_s0, 4096, %s17_s13, [#allocation4], %s1593_s15, %s1593_s15, %s1594_s16  }
   0xe   :  { %s1595_s19 = smov [#allocation6]  }
   0xf   :  { %s28_s20 = sshll.u32 %s1595_s19, 4  ;;  %s29_s20 = int_to_ptr.vmem [resolvable:$true] %s28_s20 }
  0x10   :  { %s1554_s21 = scalar_lea.vmem %s29_s20, 4096  ;;  %p1559_p6 = scmp.lt.s32.totalorder %s29_s20, %s29_s20 }
  0x11   :  { %p1555_p5 = scmp.ne.s32.totalorder %s29_s20, %s1554_s21  ;;  %p1560_p7 = scmp.lt.s32.totalorder %s1554_s21, %s1554_s21 }
  0x13   :  { %p1561_p8 = por %p1560_p7, %p1559_p6 }
  0x15   :  { %p1562_p9 = pnand %p1561_p8, %p1555_p5 }
  0x17   :  { %1565 = shalt.err (!%p1562_p9)
}
  0x18   :  { %34 = dma.hbm_to_vmem [thread:$0]  %s1707_s1, 4096, %s29_s20, [#allocation7], %s1593_s15, %s1593_s15, %s1594_s16  }
  0x19   :  { %1586 = dma.done.wait [#allocation4], 4096  }
  0x1a   :  { %1587 = vsyncadd [#allocation4], 4294963200 }
  0x1b   :  { %1588 = dma.done.wait [#allocation7], 4096  }
  0x1c   :  { %1589 = vsyncadd [#allocation7], 4294963200  ;;  %v1430_v0 = vld [vmem:[#allocation6 + $0x74] ss:$8 sps:$4 sm:$0xff]   ;;  %v1432_v1 = vld [vmem:[#allocation6 + $0x70] ss:$8 sps:$4 sm:$0xff]  }
  0x1d   :  { %559 = vmatprep.subr.bf16.mxu0 %v1430_v0  ;;  %1393 = vmatprep.subr.bf16.mxu1 %v1430_v0  ;;  %v1433_v2 = vld [vmem:[#allocation6 + $0x64] ss:$8 sps:$4 sm:$0xff]   ;;  %v1435_v3 = vld [vmem:[#allocation6 + $0x60] ss:$8 sps:$4 sm:$0xff]   ;;  %v1436_v4 = vld [vmem:[#allocation6 + $0x54] ss:$8 sps:$4 sm:$0xff]   ;;  %v949_v0 = vlaneseq }
  0x1e   :  { %560 = vmatpush1.bf16.msra.mxu0 %v1432_v1  ;;  %1409 = vmatpush1.bf16.msra.mxu1 %v1432_v1  ;;  %v1438_v5 = vld [vmem:[#allocation6 + $0x50] ss:$8 sps:$4 sm:$0xff]   ;;  %v1439_v6 = vld [vmem:[#allocation6 + $0x44] ss:$8 sps:$4 sm:$0xff]   ;;  %v1441_v7 = vld [vmem:[#allocation6 + $0x40] ss:$8 sps:$4 sm:$0xff]  }
  0x1f   :  { %561 = vmatprep.subr.bf16.mxu0 %v1433_v2  ;;  %1394 = vmatprep.subr.bf16.mxu1 %v1433_v2  ;;  %v1442_v8 = vld [vmem:[#allocation6 + $0x34] ss:$8 sps:$4 sm:$0xff]   ;;  %v1444_v9 = vld [vmem:[#allocation6 + $0x30] ss:$8 sps:$4 sm:$0xff]   ;;  %v1445_v10 = vld [vmem:[#allocation6 + $0x24] ss:$8 sps:$4 sm:$0xff]  }
  0x20   :  { %v1447_v11 = vld [vmem:[#allocation6 + $0x20] ss:$8 sps:$4 sm:$0xff]   ;;  %v1448_v12 = vld [vmem:[#allocation6 + $0x14] ss:$8 sps:$4 sm:$0xff]   ;;  %v1480_v13 = vld [vmem:[#allocation3 + $0x4] ss:$8 sps:$4 sm:$0xff]  }
  0x21   :  { %v1450_v14 = vld [vmem:[#allocation6 + $0x10] ss:$8 sps:$4 sm:$0xff]   ;;  %v1483_v15 = vld [vmem:[#allocation3 + $0x84] ss:$8 sps:$4 sm:$0xff]   ;;  %591 = vmatprep.mubr.bf16.mxu0 %v1480_v13  ;;  %v1453_v17 = vld [vmem:[#allocation6] ss:$8 sps:$4 sm:$0xff]  }
  0x22   :  { %562 = vmatpush1.bf16.msra.mxu0 %v1435_v3  ;;  %1410 = vmatpush1.bf16.msra.mxu1 %v1435_v3  ;;  %v1451_v16 = vld [vmem:[#allocation6 + $0x4] ss:$8 sps:$4 sm:$0xff]   ;;  %v1454_v18 = vld [vmem:[#allocation6 + $0xf4] ss:$8 sps:$4 sm:$0xff]   ;;  %v1456_v19 = vld [vmem:[#allocation6 + $0xf0] ss:$8 sps:$4 sm:$0xff]  }
  0x23   :  { %563 = vmatprep.subr.bf16.mxu0 %v1436_v4  ;;  %1395 = vmatprep.subr.bf16.mxu1 %v1436_v4  ;;  %v1457_v20 = vld [vmem:[#allocation6 + $0xe4] ss:$8 sps:$4 sm:$0xff]   ;;  %v1459_v21 = vld [vmem:[#allocation6 + $0xe0] ss:$8 sps:$4 sm:$0xff]   ;;  %v1460_v22 = vld [vmem:[#allocation6 + $0xd4] ss:$8 sps:$4 sm:$0xff]  }
  0x24   :  { %671 = vmatprep.mubr.bf16.mxu1 %v1483_v15  ;;  %v1462_v23 = vld [vmem:[#allocation6 + $0xd0] ss:$8 sps:$4 sm:$0xff]   ;;  %v1463_v24 = vld [vmem:[#allocation6 + $0xc4] ss:$8 sps:$4 sm:$0xff]   ;;  %v1465_v25 = vld [vmem:[#allocation6 + $0xc0] ss:$8 sps:$4 sm:$0xff]  }
  0x25   :  { %v1466_v26 = vld [vmem:[#allocation6 + $0xb4] ss:$8 sps:$4 sm:$0xff]   ;;  %v1468_v27 = vld [vmem:[#allocation6 + $0xb0] ss:$8 sps:$4 sm:$0xff]   ;;  %v1469_v28 = vld [vmem:[#allocation6 + $0xa4] ss:$8 sps:$4 sm:$0xff]  }
  0x26   :  { %564 = vmatpush1.bf16.msra.mxu0 %v1438_v5  ;;  %1411 = vmatpush1.bf16.msra.mxu1 %v1438_v5  ;;  %v1471_v29 = vld [vmem:[#allocation6 + $0xa0] ss:$8 sps:$4 sm:$0xff]   ;;  %v1472_v30 = vld [vmem:[#allocation6 + $0x94] ss:$8 sps:$4 sm:$0xff]   ;;  %v1474_v31 = vld [vmem:[#allocation6 + $0x90] ss:$8 sps:$4 sm:$0xff]  }
  0x27   :  { %565 = vmatprep.subr.bf16.mxu0 %v1439_v6  ;;  %1396 = vmatprep.subr.bf16.mxu1 %v1439_v6  ;;  %v1475_v32 = vld [vmem:[#allocation6 + $0x84] ss:$8 sps:$4 sm:$0xff]   ;;  %v1477_v33 = vld [vmem:[#allocation6 + $0x80] ss:$8 sps:$4 sm:$0xff]   ;;  %v1484_v36 = vld [vmem:[#allocation3 + $0x14] ss:$8 sps:$4 sm:$0xff]  }
  0x28   :  { %v1478_v34 = vld [vmem:[#allocation3] ss:$8 sps:$4 sm:$0xff]   ;;  %v1486_v37 = vld [vmem:[#allocation3 + $0x94] ss:$8 sps:$4 sm:$0xff]   ;;  %v1488_v38 = vld [vmem:[#allocation3 + $0x10] ss:$8 sps:$4 sm:$0xff]  }
  0x29   :  { %v1481_v35 = vld [vmem:[#allocation3 + $0x80] ss:$8 sps:$4 sm:$0xff]   ;;  %v1489_v39 = vld [vmem:[#allocation3 + $0x90] ss:$8 sps:$4 sm:$0xff]   ;;  %v1490_v40 = vld [vmem:[#allocation3 + $0x24] ss:$8 sps:$4 sm:$0xff]  }
  0x2a   :  { %566 = vmatpush1.bf16.msra.mxu0 %v1441_v7  ;;  %1412 = vmatpush1.bf16.msra.mxu1 %v1441_v7  ;;  %v1492_v41 = vld [vmem:[#allocation3 + $0xa4] ss:$8 sps:$4 sm:$0xff]   ;;  %v1494_v42 = vld [vmem:[#allocation3 + $0x20] ss:$8 sps:$4 sm:$0xff]   ;;  %v1496_v44 = vld [vmem:[#allocation3 + $0x34] ss:$8 sps:$4 sm:$0xff]  }
  0x2b   :  { %567 = vmatprep.subr.bf16.mxu0 %v1442_v8  ;;  %1397 = vmatprep.subr.bf16.mxu1 %v1442_v8  ;;  %v1495_v43 = vld [vmem:[#allocation3 + $0xa0] ss:$8 sps:$4 sm:$0xff]   ;;  %v1498_v45 = vld [vmem:[#allocation3 + $0xb4] ss:$8 sps:$4 sm:$0xff]   ;;  %v1500_v46 = vld [vmem:[#allocation3 + $0x30] ss:$8 sps:$4 sm:$0xff]  }
  0x2c   :  { %v1501_v47 = vld [vmem:[#allocation3 + $0xb0] ss:$8 sps:$4 sm:$0xff]   ;;  %v1502_v48 = vld [vmem:[#allocation3 + $0x44] ss:$8 sps:$4 sm:$0xff]   ;;  %v1506_v50 = vld [vmem:[#allocation3 + $0x40] ss:$8 sps:$4 sm:$0xff]  }
  0x2d   :  { %v1504_v49 = vld [vmem:[#allocation3 + $0xc4] ss:$8 sps:$4 sm:$0xff]   ;;  %v1507_v51 = vld [vmem:[#allocation3 + $0xc0] ss:$8 sps:$4 sm:$0xff]   ;;  %v1508_v52 = vld [vmem:[#allocation3 + $0x54] ss:$8 sps:$4 sm:$0xff]  }
  0x2e   :  { %568 = vmatpush1.bf16.msra.mxu0 %v1444_v9  ;;  %1413 = vmatpush1.bf16.msra.mxu1 %v1444_v9  ;;  %v1510_v53 = vld [vmem:[#allocation3 + $0xd4] ss:$8 sps:$4 sm:$0xff]   ;;  %v1512_v54 = vld [vmem:[#allocation3 + $0x50] ss:$8 sps:$4 sm:$0xff]   ;;  %v1514_v56 = vld [vmem:[#allocation3 + $0x64] ss:$8 sps:$4 sm:$0xff]  }
  0x2f   :  { %569 = vmatprep.subr.bf16.mxu0 %v1445_v10  ;;  %1398 = vmatprep.subr.bf16.mxu1 %v1445_v10  ;;  %v1513_v55 = vld [vmem:[#allocation3 + $0xd0] ss:$8 sps:$4 sm:$0xff]   ;;  %v1516_v57 = vld [vmem:[#allocation3 + $0xe4] ss:$8 sps:$4 sm:$0xff]   ;;  %v1518_v58 = vld [vmem:[#allocation3 + $0x60] ss:$8 sps:$4 sm:$0xff]  }
  0x30   :  { %v1519_v59 = vld [vmem:[#allocation3 + $0xe0] ss:$8 sps:$4 sm:$0xff]   ;;  %v1520_v60 = vld [vmem:[#allocation3 + $0x74] ss:$8 sps:$4 sm:$0xff]   ;;  %v1524_v62 = vld [vmem:[#allocation3 + $0x70] ss:$8 sps:$4 sm:$0xff]  }
  0x31   :  { %v1522_v61 = vld [vmem:[#allocation3 + $0xf4] ss:$8 sps:$4 sm:$0xff]   ;;  %v1525_v63 = vld [vmem:[#allocation3 + $0xf0] ss:$8 sps:$4 sm:$0xff]   ;;  %v950_v1 = vshrl.u32 %v949_v0, 7 }
  0x32   :  { %570 = vmatpush1.bf16.msra.mxu0 %v1447_v11  ;;  %1414 = vmatpush1.bf16.msra.mxu1 %v1447_v11  ;;  %v947_v4 = vld [vmem:[%s1708_s2] sm:$0x3]  ;;  %s1596_s2 = smov [#allocation8]  }
  0x33   :  { %571 = vmatprep.subr.bf16.mxu0 %v1448_v12  ;;  %1399 = vmatprep.subr.bf16.mxu1 %v1448_v12  ;;  %v951_v2 = vsub.s32 0, %v950_v1  ;;  %v955_v3 = vsub.s32 1, %v950_v1  ;;  %s1252_s24 = sshll.u32 %s1596_s2, 4  ;;  %s1253_s24 = int_to_ptr.vmem [resolvable:$true] %s1252_s24 }
  0x34   :  { %s1566_s25 = scalar_lea.vmem %s1253_s24, 4096  ;;  %p1571_p11 = scmp.lt.s32.totalorder %s1253_s24, %s1253_s24 }
  0x35   :  { %v1632_v5 = vrot.slane %v947_v4, %v951_v2  ;;  %v1634_v6 = vrot.slane %v947_v4, %v955_v3  ;;  %p1567_p10 = scmp.ne.s32.totalorder %s1253_s24, %s1566_s25  ;;  %p1572_p12 = scmp.lt.s32.totalorder %s1566_s25, %s1566_s25 }
  0x36   :  { %572 = vmatpush1.bf16.msra.mxu0 %v1450_v14  ;;  %1415 = vmatpush1.bf16.msra.mxu1 %v1450_v14 }
  0x37   :  { %573 = vmatprep.subr.bf16.mxu0 %v1451_v16  ;;  %1400 = vmatprep.subr.bf16.mxu1 %v1451_v16  ;;  %p1573_p13 = por %p1572_p12, %p1571_p11 }
  0x39   :  { %p1574_p0 = pnand %p1573_p13, %p1567_p10 }
  0x3a   :  { %574 = vmatpush1.bf16.msra.mxu0 %v1453_v17  ;;  %1416 = vmatpush1.bf16.msra.mxu1 %v1453_v17 }
  0x3b   :  { %575 = vmatprep.subr.bf16.mxu0 %v1454_v18  ;;  %1401 = vmatprep.subr.bf16.mxu1 %v1454_v18 }
  0x3e   :  { %576 = vmatpush2.bf16.msra.mxu0 %v1456_v19  ;;  %1417 = vmatpush2.bf16.msra.mxu1 %v1456_v19 }
  0x3f   :  { %577 = vmatprep.subr.bf16.mxu0 %v1457_v20  ;;  %1402 = vmatprep.subr.bf16.mxu1 %v1457_v20 }
  0x42   :  { %578 = vmatpush2.bf16.msra.mxu0 %v1459_v21  ;;  %1418 = vmatpush2.bf16.msra.mxu1 %v1459_v21 }
  0x43   :  { %579 = vmatprep.subr.bf16.mxu0 %v1460_v22  ;;  %1403 = vmatprep.subr.bf16.mxu1 %v1460_v22 }
  0x46   :  { %580 = vmatpush2.bf16.msra.mxu0 %v1462_v23  ;;  %1419 = vmatpush2.bf16.msra.mxu1 %v1462_v23 }
  0x47   :  { %581 = vmatprep.subr.bf16.mxu0 %v1463_v24  ;;  %1404 = vmatprep.subr.bf16.mxu1 %v1463_v24 }
  0x4a   :  { %582 = vmatpush2.bf16.msra.mxu0 %v1465_v25  ;;  %1420 = vmatpush2.bf16.msra.mxu1 %v1465_v25 }
  0x4b   :  { %583 = vmatprep.subr.bf16.mxu0 %v1466_v26  ;;  %1405 = vmatprep.subr.bf16.mxu1 %v1466_v26 }
  0x4e   :  { %584 = vmatpush2.bf16.msra.mxu0 %v1468_v27  ;;  %1421 = vmatpush2.bf16.msra.mxu1 %v1468_v27 }
  0x4f   :  { %585 = vmatprep.subr.bf16.mxu0 %v1469_v28  ;;  %1406 = vmatprep.subr.bf16.mxu1 %v1469_v28 }
  0x52   :  { %586 = vmatpush2.bf16.msra.mxu0 %v1471_v29  ;;  %1422 = vmatpush2.bf16.msra.mxu1 %v1471_v29 }
  0x53   :  { %587 = vmatprep.subr.bf16.mxu0 %v1472_v30  ;;  %1407 = vmatprep.subr.bf16.mxu1 %v1472_v30 }
  0x56   :  { %588 = vmatpush2.bf16.msra.mxu0 %v1474_v31  ;;  %1423 = vmatpush2.bf16.msra.mxu1 %v1474_v31 }
  0x57   :  { %589 = vmatprep.subr.bf16.mxu0 %v1475_v32  ;;  %1408 = vmatprep.subr.bf16.mxu1 %v1475_v32 }
  0x5a   :  { %590 = vmatpush2.bf16.msra.mxu0 %v1477_v33  ;;  %1424 = vmatpush2.bf16.msra.mxu1 %v1477_v33 }
  0x5d   :  { %592 = vmatmul.mubr.bf16.vlgmr.msra.gmra.mxu0 %v1478_v34  ;;  %672 = vmatmul.mubr.bf16.vlgmr.msra.gmra.mxu1 %v1481_v35 }
  0x5e   :  { %601 = vmatprep.mubr.bf16.mxu0 %v1484_v36  ;;  %681 = vmatprep.mubr.bf16.mxu1 %v1486_v37 }
  0x65   :  { %602 = vmatmul.mubr.bf16.gmra.mxu0 %v1488_v38  ;;  %682 = vmatmul.mubr.bf16.gmra.mxu1 %v1489_v39 }
  0x66   :  { %611 = vmatprep.mubr.bf16.mxu0 %v1490_v40  ;;  %691 = vmatprep.mubr.bf16.mxu1 %v1492_v41 }
  0x6d   :  { %612 = vmatmul.mubr.bf16.gmra.mxu0 %v1494_v42  ;;  %692 = vmatmul.mubr.bf16.gmra.mxu1 %v1495_v43 }
  0x6e   :  { %621 = vmatprep.mubr.bf16.mxu0 %v1496_v44  ;;  %701 = vmatprep.mubr.bf16.mxu1 %v1498_v45 }
  0x75   :  { %622 = vmatmul.mubr.bf16.gmra.mxu0 %v1500_v46  ;;  %702 = vmatmul.mubr.bf16.gmra.mxu1 %v1501_v47 }
  0x76   :  { %631 = vmatprep.mubr.bf16.mxu0 %v1502_v48  ;;  %711 = vmatprep.mubr.bf16.mxu1 %v1504_v49 }
  0x7d   :  { %632 = vmatmul.mubr.bf16.gmra.mxu0 %v1506_v50  ;;  %712 = vmatmul.mubr.bf16.gmra.mxu1 %v1507_v51 }
  0x7e   :  { %641 = vmatprep.mubr.bf16.mxu0 %v1508_v52  ;;  %721 = vmatprep.mubr.bf16.mxu1 %v1510_v53 }
  0x85   :  { %642 = vmatmul.mubr.bf16.gmra.mxu0 %v1512_v54  ;;  %722 = vmatmul.mubr.bf16.gmra.mxu1 %v1513_v55 }
  0x86   :  { %651 = vmatprep.mubr.bf16.mxu0 %v1514_v56  ;;  %731 = vmatprep.mubr.bf16.mxu1 %v1516_v57 }
  0x8d   :  { %652 = vmatmul.mubr.bf16.gmra.mxu0 %v1518_v58  ;;  %732 = vmatmul.mubr.bf16.gmra.mxu1 %v1519_v59 }
  0x8e   :  { %661 = vmatprep.mubr.bf16.mxu0 %v1520_v60  ;;  %741 = vmatprep.mubr.bf16.mxu1 %v1522_v61 }
  0x95   :  { %662 = vmatmul.mubr.bf16.gmra.mxu0 %v1524_v62  ;;  %742 = vmatmul.mubr.bf16.gmra.mxu1 %v1525_v63 }
 0x11d   :  { %v593_v7 = vpop.f32.mrf.mxu0  ;;  %v673_v8 = vpop.f32.mrf.mxu1 }
 0x11e   :  { %v959_v11 = vadd.f32 %v1632_v5, %v593_v7  ;;  %v991_v12 = vadd.f32 %v1632_v5, %v673_v8 }
 0x11f   :  { %v595_v9 = vpop.f32.mrf.mxu0  ;;  %v675_v10 = vpop.f32.mrf.mxu1 }
 0x120   :  { %v960_v13 = vadd.f32 %v1634_v6, %v595_v9  ;;  %v992_v14 = vadd.f32 %v1634_v6, %v675_v10 }
 0x121   :  { %v597_v15 = vpop.f32.mrf.mxu0  ;;  %v677_v16 = vpop.f32.mrf.mxu1 }
 0x122   :  { %v1361_v17 = vpack.c.bf16 %v960_v13, %v959_v11  ;;  %v1377_v18 = vpack.c.bf16 %v992_v14, %v991_v12  ;;  %v961_v21 = vadd.f32 %v1632_v5, %v597_v15  ;;  %v993_v22 = vadd.f32 %v1632_v5, %v677_v16 }
 0x123   :  { %v599_v19 = vpop.f32.mrf.mxu0  ;;  %v679_v20 = vpop.f32.mrf.mxu1 }
 0x124   :  { %1215 = vst [vmem:[#allocation8] sm:$0xff] %v1361_v17  ;;  %1231 = vst [vmem:[#allocation8 + $0x80] sm:$0xff] %v1377_v18  ;;  %v962_v23 = vadd.f32 %v1634_v6, %v599_v19  ;;  %v994_v24 = vadd.f32 %v1634_v6, %v679_v20 }
 0x125   :  { %v603_v25 = vpop.f32.mrf.mxu0  ;;  %v683_v26 = vpop.f32.mrf.mxu1 }
 0x126   :  { %v1362_v27 = vpack.c.bf16 %v962_v23, %v961_v21  ;;  %v1378_v28 = vpack.c.bf16 %v994_v24, %v993_v22  ;;  %v963_v31 = vadd.f32 %v1632_v5, %v603_v25  ;;  %v995_v32 = vadd.f32 %v1632_v5, %v683_v26 }
 0x127   :  { %v605_v29 = vpop.f32.mrf.mxu0  ;;  %v685_v30 = vpop.f32.mrf.mxu1 }
 0x128   :  { %1216 = vst [vmem:[#allocation8 + $0x8] sm:$0xff] %v1362_v27  ;;  %1232 = vst [vmem:[#allocation8 + $0x88] sm:$0xff] %v1378_v28  ;;  %v964_v33 = vadd.f32 %v1634_v6, %v605_v29  ;;  %v996_v34 = vadd.f32 %v1634_v6, %v685_v30 }
 0x129   :  { %v607_v35 = vpop.f32.mrf.mxu0  ;;  %v687_v36 = vpop.f32.mrf.mxu1 }
 0x12a   :  { %v1363_v37 = vpack.c.bf16 %v964_v33, %v963_v31  ;;  %v1379_v38 = vpack.c.bf16 %v996_v34, %v995_v32  ;;  %v965_v41 = vadd.f32 %v1632_v5, %v607_v35  ;;  %v997_v42 = vadd.f32 %v1632_v5, %v687_v36 }
 0x12b   :  { %v609_v39 = vpop.f32.mrf.mxu0  ;;  %v689_v40 = vpop.f32.mrf.mxu1 }
 0x12c   :  { %1217 = vst [vmem:[#allocation8 + $0x10] sm:$0xff] %v1363_v37  ;;  %1233 = vst [vmem:[#allocation8 + $0x90] sm:$0xff] %v1379_v38  ;;  %v966_v43 = vadd.f32 %v1634_v6, %v609_v39  ;;  %v998_v44 = vadd.f32 %v1634_v6, %v689_v40 }
 0x12d   :  { %v613_v45 = vpop.f32.mrf.mxu0  ;;  %v693_v46 = vpop.f32.mrf.mxu1 }
 0x12e   :  { %v1364_v47 = vpack.c.bf16 %v966_v43, %v965_v41  ;;  %v1380_v48 = vpack.c.bf16 %v998_v44, %v997_v42  ;;  %v967_v51 = vadd.f32 %v1632_v5, %v613_v45  ;;  %v999_v52 = vadd.f32 %v1632_v5, %v693_v46 }
 0x12f   :  { %v615_v49 = vpop.f32.mrf.mxu0  ;;  %v695_v50 = vpop.f32.mrf.mxu1 }
 0x130   :  { %1218 = vst [vmem:[#allocation8 + $0x18] sm:$0xff] %v1364_v47  ;;  %1234 = vst [vmem:[#allocation8 + $0x98] sm:$0xff] %v1380_v48  ;;  %v968_v53 = vadd.f32 %v1634_v6, %v615_v49  ;;  %v1000_v54 = vadd.f32 %v1634_v6, %v695_v50 }
 0x131   :  { %v617_v55 = vpop.f32.mrf.mxu0  ;;  %v697_v56 = vpop.f32.mrf.mxu1 }
 0x132   :  { %v1365_v57 = vpack.c.bf16 %v968_v53, %v967_v51  ;;  %v1381_v58 = vpack.c.bf16 %v1000_v54, %v999_v52  ;;  %v969_v61 = vadd.f32 %v1632_v5, %v617_v55  ;;  %v1001_v62 = vadd.f32 %v1632_v5, %v697_v56 }
 0x133   :  { %v619_v59 = vpop.f32.mrf.mxu0  ;;  %v699_v60 = vpop.f32.mrf.mxu1 }
 0x134   :  { %1219 = vst [vmem:[#allocation8 + $0x20] sm:$0xff] %v1365_v57  ;;  %1235 = vst [vmem:[#allocation8 + $0xa0] sm:$0xff] %v1381_v58  ;;  %v970_v63 = vadd.f32 %v1634_v6, %v619_v59  ;;  %v1002_v0 = vadd.f32 %v1634_v6, %v699_v60 }
 0x135   :  { %v623_v1 = vpop.f32.mrf.mxu0  ;;  %v703_v2 = vpop.f32.mrf.mxu1 }
 0x136   :  { %v1366_v3 = vpack.c.bf16 %v970_v63, %v969_v61  ;;  %v1382_v4 = vpack.c.bf16 %v1002_v0, %v1001_v62  ;;  %v971_v9 = vadd.f32 %v1632_v5, %v623_v1  ;;  %v1003_v10 = vadd.f32 %v1632_v5, %v703_v2 }
 0x137   :  { %v625_v7 = vpop.f32.mrf.mxu0  ;;  %v705_v8 = vpop.f32.mrf.mxu1 }
 0x138   :  { %1220 = vst [vmem:[#allocation8 + $0x28] sm:$0xff] %v1366_v3  ;;  %1236 = vst [vmem:[#allocation8 + $0xa8] sm:$0xff] %v1382_v4  ;;  %v972_v11 = vadd.f32 %v1634_v6, %v625_v7  ;;  %v1004_v12 = vadd.f32 %v1634_v6, %v705_v8 }
 0x139   :  { %v627_v13 = vpop.f32.mrf.mxu0  ;;  %v707_v14 = vpop.f32.mrf.mxu1 }
 0x13a   :  { %v1367_v15 = vpack.c.bf16 %v972_v11, %v971_v9  ;;  %v1383_v16 = vpack.c.bf16 %v1004_v12, %v1003_v10  ;;  %v973_v19 = vadd.f32 %v1632_v5, %v627_v13  ;;  %v1005_v20 = vadd.f32 %v1632_v5, %v707_v14 }
 0x13b   :  { %v629_v17 = vpop.f32.mrf.mxu0  ;;  %v709_v18 = vpop.f32.mrf.mxu1 }
 0x13c   :  { %1221 = vst [vmem:[#allocation8 + $0x30] sm:$0xff] %v1367_v15  ;;  %1237 = vst [vmem:[#allocation8 + $0xb0] sm:$0xff] %v1383_v16  ;;  %v974_v21 = vadd.f32 %v1634_v6, %v629_v17  ;;  %v1006_v22 = vadd.f32 %v1634_v6, %v709_v18 }
 0x13d   :  { %v633_v23 = vpop.f32.mrf.mxu0  ;;  %v713_v24 = vpop.f32.mrf.mxu1 }
 0x13e   :  { %v1368_v25 = vpack.c.bf16 %v974_v21, %v973_v19  ;;  %v1384_v26 = vpack.c.bf16 %v1006_v22, %v1005_v20  ;;  %v975_v29 = vadd.f32 %v1632_v5, %v633_v23  ;;  %v1007_v30 = vadd.f32 %v1632_v5, %v713_v24 }
 0x13f   :  { %v635_v27 = vpop.f32.mrf.mxu0  ;;  %v715_v28 = vpop.f32.mrf.mxu1 }
 0x140   :  { %1222 = vst [vmem:[#allocation8 + $0x38] sm:$0xff] %v1368_v25  ;;  %1238 = vst [vmem:[#allocation8 + $0xb8] sm:$0xff] %v1384_v26  ;;  %v976_v31 = vadd.f32 %v1634_v6, %v635_v27  ;;  %v1008_v32 = vadd.f32 %v1634_v6, %v715_v28 }
 0x141   :  { %v637_v33 = vpop.f32.mrf.mxu0  ;;  %v717_v34 = vpop.f32.mrf.mxu1 }
 0x142   :  { %v1369_v35 = vpack.c.bf16 %v976_v31, %v975_v29  ;;  %v1385_v36 = vpack.c.bf16 %v1008_v32, %v1007_v30  ;;  %v977_v39 = vadd.f32 %v1632_v5, %v637_v33  ;;  %v1009_v40 = vadd.f32 %v1632_v5, %v717_v34 }
 0x143   :  { %v639_v37 = vpop.f32.mrf.mxu0  ;;  %v719_v38 = vpop.f32.mrf.mxu1 }
 0x144   :  { %1223 = vst [vmem:[#allocation8 + $0x40] sm:$0xff] %v1369_v35  ;;  %1239 = vst [vmem:[#allocation8 + $0xc0] sm:$0xff] %v1385_v36  ;;  %v978_v41 = vadd.f32 %v1634_v6, %v639_v37  ;;  %v1010_v42 = vadd.f32 %v1634_v6, %v719_v38 }
 0x145   :  { %v643_v43 = vpop.f32.mrf.mxu0  ;;  %v723_v44 = vpop.f32.mrf.mxu1 }
 0x146   :  { %v1370_v45 = vpack.c.bf16 %v978_v41, %v977_v39  ;;  %v1386_v46 = vpack.c.bf16 %v1010_v42, %v1009_v40  ;;  %v979_v49 = vadd.f32 %v1632_v5, %v643_v43  ;;  %v1011_v50 = vadd.f32 %v1632_v5, %v723_v44 }
 0x147   :  { %v645_v47 = vpop.f32.mrf.mxu0  ;;  %v725_v48 = vpop.f32.mrf.mxu1 }
 0x148   :  { %1224 = vst [vmem:[#allocation8 + $0x48] sm:$0xff] %v1370_v45  ;;  %1240 = vst [vmem:[#allocation8 + $0xc8] sm:$0xff] %v1386_v46  ;;  %v980_v51 = vadd.f32 %v1634_v6, %v645_v47  ;;  %v1012_v52 = vadd.f32 %v1634_v6, %v725_v48 }
 0x149   :  { %v647_v53 = vpop.f32.mrf.mxu0  ;;  %v727_v54 = vpop.f32.mrf.mxu1 }
 0x14a   :  { %v1371_v55 = vpack.c.bf16 %v980_v51, %v979_v49  ;;  %v1387_v56 = vpack.c.bf16 %v1012_v52, %v1011_v50  ;;  %v981_v59 = vadd.f32 %v1632_v5, %v647_v53  ;;  %v1013_v60 = vadd.f32 %v1632_v5, %v727_v54 }
 0x14b   :  { %v649_v57 = vpop.f32.mrf.mxu0  ;;  %v729_v58 = vpop.f32.mrf.mxu1 }
 0x14c   :  { %1225 = vst [vmem:[#allocation8 + $0x50] sm:$0xff] %v1371_v55  ;;  %1241 = vst [vmem:[#allocation8 + $0xd0] sm:$0xff] %v1387_v56  ;;  %v982_v61 = vadd.f32 %v1634_v6, %v649_v57  ;;  %v1014_v62 = vadd.f32 %v1634_v6, %v729_v58 }
 0x14d   :  { %v653_v63 = vpop.f32.mrf.mxu0  ;;  %v733_v0 = vpop.f32.mrf.mxu1 }
 0x14e   :  { %v1372_v1 = vpack.c.bf16 %v982_v61, %v981_v59  ;;  %v1388_v2 = vpack.c.bf16 %v1014_v62, %v1013_v60  ;;  %v983_v7 = vadd.f32 %v1632_v5, %v653_v63  ;;  %v1015_v8 = vadd.f32 %v1632_v5, %v733_v0 }
 0x14f   :  { %v655_v3 = vpop.f32.mrf.mxu0  ;;  %v735_v4 = vpop.f32.mrf.mxu1 }
 0x150   :  { %1226 = vst [vmem:[#allocation8 + $0x58] sm:$0xff] %v1372_v1  ;;  %1242 = vst [vmem:[#allocation8 + $0xd8] sm:$0xff] %v1388_v2  ;;  %v984_v9 = vadd.f32 %v1634_v6, %v655_v3  ;;  %v1016_v10 = vadd.f32 %v1634_v6, %v735_v4 }
 0x151   :  { %v657_v11 = vpop.f32.mrf.mxu0  ;;  %v737_v12 = vpop.f32.mrf.mxu1 }
 0x152   :  { %v1373_v13 = vpack.c.bf16 %v984_v9, %v983_v7  ;;  %v1389_v14 = vpack.c.bf16 %v1016_v10, %v1015_v8  ;;  %v985_v17 = vadd.f32 %v1632_v5, %v657_v11  ;;  %v1017_v18 = vadd.f32 %v1632_v5, %v737_v12 }
 0x153   :  { %v659_v15 = vpop.f32.mrf.mxu0  ;;  %v739_v16 = vpop.f32.mrf.mxu1 }
 0x154   :  { %1227 = vst [vmem:[#allocation8 + $0x60] sm:$0xff] %v1373_v13  ;;  %1243 = vst [vmem:[#allocation8 + $0xe0] sm:$0xff] %v1389_v14  ;;  %v986_v19 = vadd.f32 %v1634_v6, %v659_v15  ;;  %v1018_v20 = vadd.f32 %v1634_v6, %v739_v16 }
 0x155   :  { %v663_v21 = vpop.f32.mrf.mxu0  ;;  %v743_v22 = vpop.f32.mrf.mxu1 }
 0x156   :  { %v1374_v23 = vpack.c.bf16 %v986_v19, %v985_v17  ;;  %v1390_v24 = vpack.c.bf16 %v1018_v20, %v1017_v18  ;;  %v987_v27 = vadd.f32 %v1632_v5, %v663_v21  ;;  %v1019_v28 = vadd.f32 %v1632_v5, %v743_v22 }
 0x157   :  { %v665_v25 = vpop.f32.mrf.mxu0  ;;  %v745_v26 = vpop.f32.mrf.mxu1 }
 0x158   :  { %1228 = vst [vmem:[#allocation8 + $0x68] sm:$0xff] %v1374_v23  ;;  %1244 = vst [vmem:[#allocation8 + $0xe8] sm:$0xff] %v1390_v24  ;;  %v988_v29 = vadd.f32 %v1634_v6, %v665_v25  ;;  %v1020_v30 = vadd.f32 %v1634_v6, %v745_v26 }
 0x159   :  { %v667_v31 = vpop.f32.mrf.mxu0  ;;  %v747_v32 = vpop.f32.mrf.mxu1 }
 0x15a   :  { %v1375_v33 = vpack.c.bf16 %v988_v29, %v987_v27  ;;  %v1391_v34 = vpack.c.bf16 %v1020_v30, %v1019_v28  ;;  %v989_v37 = vadd.f32 %v1632_v5, %v667_v31  ;;  %v1021_v38 = vadd.f32 %v1632_v5, %v747_v32 }
 0x15b   :  { %v669_v35 = vpop.f32.mrf.mxu0  ;;  %v749_v36 = vpop.f32.mrf.mxu1 }
 0x15c   :  { %1229 = vst [vmem:[#allocation8 + $0x70] sm:$0xff] %v1375_v33  ;;  %1245 = vst [vmem:[#allocation8 + $0xf0] sm:$0xff] %v1391_v34  ;;  %v990_v39 = vadd.f32 %v1634_v6, %v669_v35  ;;  %v1022_v40 = vadd.f32 %v1634_v6, %v749_v36 }
 0x15e   :  { %v1376_v41 = vpack.c.bf16 %v990_v39, %v989_v37  ;;  %v1392_v42 = vpack.c.bf16 %v1022_v40, %v1021_v38 }
 0x160   :  { %1230 = vst [vmem:[#allocation8 + $0x78] sm:$0xff] %v1376_v41  ;;  %1246 = vst [vmem:[#allocation8 + $0xf8] sm:$0xff] %v1392_v42 }
 0x161   :  { %1577 = shalt.err (!%p1574_p0)
}
 0x162   :  { %1258 = dma.vmem_to_hbm [thread:$0]  %s1253_s24, 4096, %s1709_s3, [#allocation5], %s1593_s15, %s1593_s15, %s1594_s16  }
 0x163   :  { %1590 = dma.done.wait [#allocation5], 4096  }
 0x164   :  { %1591 = vsyncadd [#allocation5], 4294963200 }
 0x165   :  { %1262 = vsyncpa [#allocation4], 1 }
 0x166   :  { %1263 = vsyncpa [#allocation7], 1 }
 0x167   :  { %1264 = vsyncpa [#allocation5], 1 }

</bundles_post_ra>
